<compile_context>
chip_gen: v6e
topology: v6e:2x2x1
jax: 0.10.0
libtpu: 0.0.40
codegen_flags: <defaults>
</compile_context>

<pallas_src>
import jax
import jax.numpy as jnp
from jax.experimental import pallas as pl
from jax.experimental.pallas import tpu as pltpu

LANE = 128  # lane width used for feature-dim padding


def make_mlp_kernel(num_layers, in_dim, out_dim):
    def kernel(x_ref, w_ref, b_ref, out_ref):
        # x_ref : (tile_b, in_dim)            f32, raw (un-padded) input features
        # w_ref : (num_layers, LANE, LANE)    bf16, zero-padded weight slab (VMEM-resident)
        # b_ref : (num_layers, LANE)          f32,  zero-padded bias slab   (VMEM-resident)
        # out_ref: (tile_b, LANE)             bf16, lane-dense padded output

        # ---- layer 1: cast in-register, contract only over the real in_dim ----
        h = x_ref[...].astype(jnp.bfloat16)                  # (tile_b, in_dim)
        w0 = w_ref[0]                                        # (LANE, LANE)
        z = jnp.dot(h, w0[:in_dim, :], preferred_element_type=jnp.float32)
        z = z + b_ref[0:1, :]                                # f32 bias broadcast

        # ---- layers 2..num_layers: ReLU then matmul (static unroll) ----
        for i in range(1, num_layers):
            h = jnp.maximum(z, 0.0).astype(jnp.bfloat16)     # (tile_b, LANE)
            z = jnp.dot(h, w_ref[i], preferred_element_type=jnp.float32)
            z = z + b_ref[i:i + 1, :]

        # ---- softmax over the valid (un-padded) output lanes only ----
        col = jax.lax.broadcasted_iota(jnp.int32, z.shape, 1)
        logits = jnp.where(col < out_dim, z, -jnp.inf)       # padded lanes -> exp = 0
        m = jnp.max(logits, axis=1, keepdims=True)
        e = jnp.exp(logits - m)
        denom = jnp.sum(e, axis=1, keepdims=True)
        out_ref[...] = (e / denom).astype(out_ref.dtype)     # exact divide (rows sum to 1)

    return kernel


def _pick_tile_b(B):
    """Largest tile that still leaves >=2 grid steps (keeps both v7x TCs busy)."""
    for tb in (512, 256, 128):
        if B >= 2 * tb:
            return tb
    return 128


def pack_params(params):
    """One-time packing of (w, b) pairs into lane-dense, 128-padded slabs."""
    num_layers = len(params)
    w_slab = jnp.zeros((num_layers, LANE, LANE), jnp.bfloat16)
    b_slab = jnp.zeros((num_layers, LANE), jnp.float32)
    for i, (w, b) in enumerate(params):
        w_slab = w_slab.at[i, :w.shape[0], :w.shape[1]].set(w.astype(jnp.bfloat16))
        b_slab = b_slab.at[i, :b.shape[-1]].set(b.reshape(-1).astype(jnp.float32))
    return w_slab, b_slab


def mlp_forward(x, w_slab, b_slab, *, out_dim, tile_b=None):
    B, in_dim = x.shape
    num_layers = w_slab.shape[0]

    if tile_b is None:
        tile_b = _pick_tile_b(B)

    # pad the batch only if needed (demo batch divides evenly -> no-op)
    B_pad = pl.cdiv(B, tile_b) * tile_b
    if B_pad != B:
        x = jnp.pad(x, ((0, B_pad - B), (0, 0)))

    grid = (B_pad // tile_b,)
    kernel = make_mlp_kernel(num_layers, in_dim, out_dim)

    cost = pl.CostEstimate(
        flops=2 * B_pad * num_layers * LANE * LANE,
        transcendentals=B_pad * LANE,
        bytes_accessed=(B_pad * in_dim * 4          # x (f32)
                        + w_slab.size * 2           # weight slab (bf16)
                        + b_slab.size * 4           # bias slab (f32)
                        + B_pad * LANE * 2),        # output (bf16)
    )

    out_pad = pl.pallas_call(
        kernel,
        out_shape=jax.ShapeDtypeStruct((B_pad, LANE), jnp.bfloat16),
        grid_spec=pltpu.PrefetchScalarGridSpec(
            num_scalar_prefetch=0,
            grid=grid,
            in_specs=[
                # x: tiled over the batch axis (pipelined, double-buffered);
                # last block dim == full array dim -> (8,128) rule satisfied.
                pl.BlockSpec((tile_b, in_dim), lambda i: (i, 0)),
                # weight / bias slabs: constant index_map -> VMEM-resident
                pl.BlockSpec((num_layers, LANE, LANE), lambda i: (0, 0, 0)),
                pl.BlockSpec((num_layers, LANE), lambda i: (0, 0)),
            ],
            out_specs=pl.BlockSpec((tile_b, LANE), lambda i: (i, 0)),
        ),
        compiler_params=pltpu.CompilerParams(
            dimension_semantics=("parallel",)),
        cost_estimate=cost,
    )(x, w_slab, b_slab)

    # slice off batch padding and the 128-lane output padding
    return out_pad[:B, :out_dim]


def init_params(key, sizes):
    """Deterministic init. sizes = [input, h1, h2, h3, h4, output]."""
    params = []
    for i in range(len(sizes) - 1):
        fan_in, fan_out = sizes[i], sizes[i + 1]
        key, kw, kb = jax.random.split(key, 3)
        bound = 1.0 / (fan_in ** 0.5)
        w = jax.random.uniform(kw, (fan_in, fan_out), jnp.float32, -bound, bound)
        b = jax.random.uniform(kb, (1, fan_out), jnp.float32, -bound, bound)
        params.append((w, b))
    return params


def mlp_reference(x, params):
    h = x
    for i, (w, b) in enumerate(params):
        h = h @ w + b
        if i < len(params) - 1:
            h = jnp.maximum(h, 0.0)
    return jax.nn.softmax(h, axis=1)


if __name__ == "__main__":
    key = jax.random.PRNGKey(0)
    # MLP(input_size=32, hidden1=64, hidden2=64, hidden3=32, hidden4=32, output=16)
    sizes = [32, 64, 64, 32, 32, 16]
    batch = 256  # two 128-row batch tiles -> exercises the parallel grid (both v7x TCs)

    key, kx = jax.random.split(key)
    x = jax.random.normal(kx, (batch, sizes[0]), jnp.float32)
    params = init_params(key, sizes)

    # slab packing is hoisted out of the per-call path (done once at init time)
    w_slab, b_slab = pack_params(params)

    forward = jax.jit(mlp_forward, static_argnames=("out_dim", "tile_b"))
    out = forward(x, w_slab, b_slab, out_dim=sizes[-1])
    out = jax.block_until_ready(out)

    ref = mlp_reference(x, params)
    assert out.shape == (batch, sizes[-1])
    out_f32 = out.astype(jnp.float32)
    # bf16 matmuls + bf16 output => loosened tolerance vs f32 reference
    assert jnp.allclose(out_f32, ref, atol=3e-2), "mismatch vs reference"
    # exact divide in-kernel; only the bf16 output rounding perturbs the row sums
    assert jnp.allclose(jnp.sum(out_f32, axis=1), 1.0, atol=5e-3), \
        "softmax rows must sum to 1"

    print("KERNEL_OK")
</pallas_src>

<mosaic_0001>
module attributes {stable_mosaic.version = 11 : i64} {
  func.func @kernel(%arg0: i32, %arg1: memref<128x32xf32, #tpu.memory_space<vmem>>, %arg2: memref<5x128x128xbf16, #tpu.memory_space<vmem>>, %arg3: memref<5x128xf32, #tpu.memory_space<vmem>>, %arg4: memref<128x128xbf16, #tpu.memory_space<vmem>>) attributes {dimension_semantics = [#tpu.dimension_semantics<parallel>], iteration_bounds = array<i64: 2>, scalar_prefetch = 0 : i64, scratch_operands = 0 : i64, tpu.core_type = #tpu.core_type<tc>, window_params = [{transform_indices = @transform_0, window_bounds = array<i64: 128, 32>}, {pipeline_mode = #tpu.pipeline_mode<synchronous>, transform_indices = @transform_1, window_bounds = array<i64: 5, 128, 128>}, {pipeline_mode = #tpu.pipeline_mode<synchronous>, transform_indices = @transform_2, window_bounds = array<i64: 5, 128>}, {transform_indices = @transform_3, window_bounds = array<i64: 128, 128>}]} {
    %c0 = arith.constant 0 : index
    %c0_0 = arith.constant 0 : index
    %0 = vector.load %arg1[%c0, %c0_0] : memref<128x32xf32, #tpu.memory_space<vmem>>, vector<128x32xf32>
    %1 = arith.truncf %0 : vector<128x32xf32> to vector<128x32xbf16>
    %c0_1 = arith.constant 0 : index
    %c0_2 = arith.constant 0 : index
    %c0_3 = arith.constant 0 : index
    %2 = vector.load %arg2[%c0_1, %c0_2, %c0_3] : memref<5x128x128xbf16, #tpu.memory_space<vmem>>, vector<1x128x128xbf16>
    %3 = vector.shape_cast %2 : vector<1x128x128xbf16> to vector<128x128xbf16>
    %4 = vector.extract_strided_slice %3 {offsets = [0, 0], sizes = [32, 128], strides = [1, 1]} : vector<128x128xbf16> to vector<32x128xbf16>
    %cst = arith.constant dense<0.000000e+00> : vector<128x128xf32>
    %5 = tpu.matmul %1, %4, %cst {dimension_numbers = #tpu.dot_dimension_numbers<[1], [0], [0], [1], [0, 0, 1, 1], [], []>} : vector<128x32xbf16>, vector<32x128xbf16>, vector<128x128xf32> -> vector<128x128xf32>
    %c0_4 = arith.constant 0 : index
    %c0_5 = arith.constant 0 : index
    %6 = vector.load %arg3[%c0_4, %c0_5] : memref<5x128xf32, #tpu.memory_space<vmem>>, vector<1x128xf32>
    %7 = vector.broadcast %6 : vector<1x128xf32> to vector<128x128xf32>
    %8 = arith.addf %5, %7 : vector<128x128xf32>
    %cst_6 = arith.constant 0.000000e+00 : f32
    %9 = vector.broadcast %cst_6 : f32 to vector<128x128xf32>
    %10 = arith.maximumf %8, %9 : vector<128x128xf32>
    %11 = arith.truncf %10 : vector<128x128xf32> to vector<128x128xbf16>
    %c1 = arith.constant 1 : index
    %c0_7 = arith.constant 0 : index
    %c0_8 = arith.constant 0 : index
    %12 = vector.load %arg2[%c1, %c0_7, %c0_8] : memref<5x128x128xbf16, #tpu.memory_space<vmem>>, vector<1x128x128xbf16>
    %13 = vector.shape_cast %12 : vector<1x128x128xbf16> to vector<128x128xbf16>
    %cst_9 = arith.constant dense<0.000000e+00> : vector<128x128xf32>
    %14 = tpu.matmul %11, %13, %cst_9 {dimension_numbers = #tpu.dot_dimension_numbers<[1], [0], [0], [1], [0, 0, 1, 1], [], []>} : vector<128x128xbf16>, vector<128x128xbf16>, vector<128x128xf32> -> vector<128x128xf32>
    %c1_10 = arith.constant 1 : index
    %c0_11 = arith.constant 0 : index
    %15 = vector.load %arg3[%c1_10, %c0_11] : memref<5x128xf32, #tpu.memory_space<vmem>>, vector<1x128xf32>
    %16 = vector.broadcast %15 : vector<1x128xf32> to vector<128x128xf32>
    %17 = arith.addf %14, %16 : vector<128x128xf32>
    %cst_12 = arith.constant 0.000000e+00 : f32
    %18 = vector.broadcast %cst_12 : f32 to vector<128x128xf32>
    %19 = arith.maximumf %17, %18 : vector<128x128xf32>
    %20 = arith.truncf %19 : vector<128x128xf32> to vector<128x128xbf16>
    %c2 = arith.constant 2 : index
    %c0_13 = arith.constant 0 : index
    %c0_14 = arith.constant 0 : index
    %21 = vector.load %arg2[%c2, %c0_13, %c0_14] : memref<5x128x128xbf16, #tpu.memory_space<vmem>>, vector<1x128x128xbf16>
    %22 = vector.shape_cast %21 : vector<1x128x128xbf16> to vector<128x128xbf16>
    %cst_15 = arith.constant dense<0.000000e+00> : vector<128x128xf32>
    %23 = tpu.matmul %20, %22, %cst_15 {dimension_numbers = #tpu.dot_dimension_numbers<[1], [0], [0], [1], [0, 0, 1, 1], [], []>} : vector<128x128xbf16>, vector<128x128xbf16>, vector<128x128xf32> -> vector<128x128xf32>
    %c2_16 = arith.constant 2 : index
    %c0_17 = arith.constant 0 : index
    %24 = vector.load %arg3[%c2_16, %c0_17] : memref<5x128xf32, #tpu.memory_space<vmem>>, vector<1x128xf32>
    %25 = vector.broadcast %24 : vector<1x128xf32> to vector<128x128xf32>
    %26 = arith.addf %23, %25 : vector<128x128xf32>
    %cst_18 = arith.constant 0.000000e+00 : f32
    %27 = vector.broadcast %cst_18 : f32 to vector<128x128xf32>
    %28 = arith.maximumf %26, %27 : vector<128x128xf32>
    %29 = arith.truncf %28 : vector<128x128xf32> to vector<128x128xbf16>
    %c3 = arith.constant 3 : index
    %c0_19 = arith.constant 0 : index
    %c0_20 = arith.constant 0 : index
    %30 = vector.load %arg2[%c3, %c0_19, %c0_20] : memref<5x128x128xbf16, #tpu.memory_space<vmem>>, vector<1x128x128xbf16>
    %31 = vector.shape_cast %30 : vector<1x128x128xbf16> to vector<128x128xbf16>
    %cst_21 = arith.constant dense<0.000000e+00> : vector<128x128xf32>
    %32 = tpu.matmul %29, %31, %cst_21 {dimension_numbers = #tpu.dot_dimension_numbers<[1], [0], [0], [1], [0, 0, 1, 1], [], []>} : vector<128x128xbf16>, vector<128x128xbf16>, vector<128x128xf32> -> vector<128x128xf32>
    %c3_22 = arith.constant 3 : index
    %c0_23 = arith.constant 0 : index
    %33 = vector.load %arg3[%c3_22, %c0_23] : memref<5x128xf32, #tpu.memory_space<vmem>>, vector<1x128xf32>
    %34 = vector.broadcast %33 : vector<1x128xf32> to vector<128x128xf32>
    %35 = arith.addf %32, %34 : vector<128x128xf32>
    %cst_24 = arith.constant 0.000000e+00 : f32
    %36 = vector.broadcast %cst_24 : f32 to vector<128x128xf32>
    %37 = arith.maximumf %35, %36 : vector<128x128xf32>
    %38 = arith.truncf %37 : vector<128x128xf32> to vector<128x128xbf16>
    %c4 = arith.constant 4 : index
    %c0_25 = arith.constant 0 : index
    %c0_26 = arith.constant 0 : index
    %39 = vector.load %arg2[%c4, %c0_25, %c0_26] : memref<5x128x128xbf16, #tpu.memory_space<vmem>>, vector<1x128x128xbf16>
    %40 = vector.shape_cast %39 : vector<1x128x128xbf16> to vector<128x128xbf16>
    %cst_27 = arith.constant dense<0.000000e+00> : vector<128x128xf32>
    %41 = tpu.matmul %38, %40, %cst_27 {dimension_numbers = #tpu.dot_dimension_numbers<[1], [0], [0], [1], [0, 0, 1, 1], [], []>} : vector<128x128xbf16>, vector<128x128xbf16>, vector<128x128xf32> -> vector<128x128xf32>
    %c4_28 = arith.constant 4 : index
    %c0_29 = arith.constant 0 : index
    %42 = vector.load %arg3[%c4_28, %c0_29] : memref<5x128xf32, #tpu.memory_space<vmem>>, vector<1x128xf32>
    %43 = vector.broadcast %42 : vector<1x128xf32> to vector<128x128xf32>
    %44 = arith.addf %41, %43 : vector<128x128xf32>
    %45 = tpu.iota {dimensions = array<i32: 1>} : vector<128x128xi32>
    %c16_i32 = arith.constant 16 : i32
    %46 = vector.broadcast %c16_i32 : i32 to vector<128x128xi32>
    %47 = arith.cmpi slt, %45, %46 : vector<128x128xi32>
    %cst_30 = arith.constant 0xFF800000 : f32
    %48 = vector.broadcast %cst_30 : f32 to vector<128x128xf32>
    %49 = arith.select %47, %44, %48 : vector<128x128xi1>, vector<128x128xf32>
    %cst_31 = arith.constant dense<0xFF800000> : vector<128xf32>
    %50 = vector.multi_reduction <maximumf>, %49, %cst_31 [1] : vector<128x128xf32> to vector<128xf32>
    %51 = vector.shape_cast %50 : vector<128xf32> to vector<128x1xf32>
    %52 = vector.broadcast %51 : vector<128x1xf32> to vector<128x128xf32>
    %53 = arith.subf %49, %52 : vector<128x128xf32>
    %54 = math.exp %53 : vector<128x128xf32>
    %cst_32 = arith.constant dense<0.000000e+00> : vector<128xf32>
    %55 = vector.multi_reduction <add>, %54, %cst_32 [1] : vector<128x128xf32> to vector<128xf32>
    %56 = vector.shape_cast %55 : vector<128xf32> to vector<128x1xf32>
    %57 = vector.broadcast %56 : vector<128x1xf32> to vector<128x128xf32>
    %58 = arith.divf %54, %57 : vector<128x128xf32>
    %59 = arith.truncf %58 : vector<128x128xf32> to vector<128x128xbf16>
    %c0_33 = arith.constant 0 : index
    %c0_34 = arith.constant 0 : index
    %60 = vector.load %arg4[%c0_33, %c0_34] : memref<128x128xbf16, #tpu.memory_space<vmem>>, vector<128x128xbf16>
    tpu.vector_store %arg4[%c0_33, %c0_34], %59 {strides = array<i32>} : memref<128x128xbf16, #tpu.memory_space<vmem>>, vector<128x128xbf16>,
    return
  }
  func.func @transform_0(%arg0: i32) -> (i32, i32) {
    %c0_i32 = arith.constant 0 : i32
    %c0_i32_0 = arith.constant 0 : i32
    return %arg0, %c0_i32 : i32, i32
  }
  func.func @transform_1(%arg0: i32) -> (i32, i32, i32) {
    %c0_i32 = arith.constant 0 : i32
    %c0_i32_0 = arith.constant 0 : i32
    %c0_i32_1 = arith.constant 0 : i32
    %c0_i32_2 = arith.constant 0 : i32
    return %c0_i32, %c0_i32_0, %c0_i32_1 : i32, i32, i32
  }
  func.func @transform_2(%arg0: i32) -> (i32, i32) {
    %c0_i32 = arith.constant 0 : i32
    %c0_i32_0 = arith.constant 0 : i32
    %c0_i32_1 = arith.constant 0 : i32
    return %c0_i32, %c0_i32_0 : i32, i32
  }
  func.func @transform_3(%arg0: i32) -> (i32, i32) {
    %c0_i32 = arith.constant 0 : i32
    %c0_i32_0 = arith.constant 0 : i32
    return %arg0, %c0_i32 : i32, i32
  }
}

</mosaic_0001>

<bundles_post_ra>
// kernel: mlp_forward.1
= control target key start
LH: loop header
LB: loop body
LE: loop exit
PB: predicated region body
PF: predicated region fallthrough
CT: control target
= control target key end

     0   :  { %8 = vsyncpa [#allocation3], 0  ;;  %s2031_s12 = smov 0   ;;  %s2354_s0 = inlined_call_operand.vmem [shape: f32[256,32], index: 0, kind: input, shape index: {}]   ;;  %s2355_s1 = inlined_call_operand.vmem [shape: bf16[5,128,128], index: 1, kind: input, shape index: {}]   ;;  %s2356_s2 = inlined_call_operand.hbm [shape: f32[5,128], index: 2, kind: input, shape index: {}]   ;;  %s2357_s3 = inlined_call_operand.vmem [shape: bf16[256,128], index: 3, kind: output, shape index: {}]  }
   0x1 LB: > { %s1430_s13 = sadd.s32 4294967295, %s2008_s12   ;;  %p1432_p0 = scmp.ge.s32.totalorder %s2008_s12, 1  ;;  %s2008_s12 = sphi %s2031_s12, %s14_s12  }
   0x2   : > { %p113_p1 = scmp.lt.s32.totalorder %s2008_s12, 3  ;;  %p2043_p3 = scmp.eq.s32.totalorder %s1430_s13, 0 }
   0x3   : > { %s2010_s16 = smov [#allocation2]  }
   0x4   : > { %p2039_p2 = pnand %p1432_p0, %p113_p1  ;;  %s129_s17 = sshll.u32 %s2010_s16, 4  ;;  %s130_s17 = int_to_ptr.vmem [resolvable:$true] %s129_s17 }
   0x5   : > { %s1983_s18 = scalar_lea.vmem %s130_s17, 128  ;;  %p1991_p10 = scmp.lt.s32.totalorder %s130_s17, %s130_s17 }
   0x6   : > { %p1859_p4 = pneg %p2039_p2  ;;  %p1984_p7 = scmp.ne.s32.totalorder %s130_s17, %s1983_s18 }
   0x7   : > { %p1992_p11 = scmp.lt.s32.totalorder %s1983_s18, %s1983_s18 }
   0x8   : > { %p1860_p5 = pnand %p2043_p3, %p1859_p4 }
   0x9   : > { %p1993_p12 = por %p1992_p11, %p1991_p10 }
   0xa   : > { %p1974_p6 = pneg %p1860_p5 }
   0xc   : > { %p1986_p8 = pnand %p1984_p7, %p1974_p6 }
   0xe   : > { %p1987_p9 = pneg %p1986_p8 }
  0x10   : > { %p1994_p13 = pnand %p1993_p12, %p1987_p9 }
  0x12   : > { %1997 = shalt.err (!%p1994_p13)
}
  0x13   : > { %1862 = dma.hbm_to_vmem [thread:$0]  (!%p1860_p5), %s2356_s2, 128, %s130_s17, [#allocation3]  }
  0x14   : > { %151 = sbr.rel (%p2039_p2) target bundleno = 1403 (0x57b), region = 32 }
  0x19   : > { %2003 = dma.done.wait (%p2043_p3), [#allocation3], 128  }
  0x1a   : > { %2005 = vsyncadd (%p2043_p3), [#allocation3], 4294967168  ;;  %s1437_s21 = sshll.u32 %s1430_s13, 4  ;;  %v1874_v0 = vld [vmem:[%s2355_s1 + $0x8] sm:$0xff]   ;;  %v1875_v1 = vld [vmem:[%s2355_s1] sm:$0xff]   ;;  %vm233_vm0 = vcmask 261120  }
  0x1b   : > { %p176_p0 = scmp.lt.s32.totalorder %s1437_s21, 31  ;;  %1707 = vmatprep.subr.bf16.mxu0 %v1874_v0  ;;  %v1876_v11 = vld [vmem:[%s2355_s1 + $0x78] sm:$0xff]   ;;  %v1877_v14 = vld [vmem:[%s2355_s1 + $0x70] sm:$0xff]   ;;  %v1878_v17 = vld [vmem:[%s2355_s1 + $0x68] sm:$0xff]  }
  0x1c   : > { %1708 = vmatpush3.bf16.msra.mxu0 %v1874_v0  ;;  %1727 = vmatprep.subr.bf16.mxu1 %v1876_v11  ;;  %v1879_v19 = vld [vmem:[%s2355_s1 + $0x60] sm:$0xff]   ;;  %v1880_v25 = vld [vmem:[%s2355_s1 + $0x58] sm:$0xff]   ;;  %v1881_v31 = vld [vmem:[%s2355_s1 + $0x50] sm:$0xff]  }
  0x1d   : > { %s2361_s21 = smov (!%p176_p0, %s1437_s21), 31  ;;  %1709 = vmatprep.subr.bf16.mxu0 %v1875_v1  ;;  %1728 = vmatpush3.bf16.msra.mxu1 %v1876_v11  ;;  %v1882_v32 = vld [vmem:[%s2355_s1 + $0x48] sm:$0xff]   ;;  %v1883_v33 = vld [vmem:[%s2355_s1 + $0x40] sm:$0xff]   ;;  %v1884_v34 = vld [vmem:[%s2355_s1 + $0xb8] sm:$0xff]  }
  0x1e   : > { %s1438_s22 = sshll.u32 %s2361_s21, 3  ;;  %1729 = vmatprep.subr.bf16.mxu1 %v1877_v14  ;;  %v1885_v35 = vld [vmem:[%s2355_s1 + $0xb0] sm:$0xff]   ;;  %v1886_v36 = vld [vmem:[%s2355_s1 + $0xa8] sm:$0xff]   ;;  %v1887_v37 = vld [vmem:[%s2355_s1 + $0xa0] sm:$0xff]   ;;  %s1440_s18 = sshll.u32 %s2361_s21, 2 }
  0x1f   : > { %s2066_s25 = scalar_lea.vmem %s2354_s0, %s1438_s22  ;;  %v1888_v38 = vld [vmem:[%s2355_s1 + $0x98] sm:$0xff]   ;;  %v1441_v41 = vld [vmem:[#allocation2] ss:$0 sm:$0xff]  ;;  %s2327_s22 = scalar_lea.vmem %s2357_s3, %s1440_s18 }
  0x20   : > { %v188_v2 = vld [vmem:[%s2066_s25] sm:$0xff]  ;;  %v189_v3 = vld [vmem:[%s2066_s25 + $0x8] sm:$0xff]  ;;  %v190_v5 = vld [vmem:[%s2066_s25 + $0x10] sm:$0xff]  ;;  %1710 = vmatpush3.bf16.msra.mxu0 %v1875_v1 }
  0x21   : > { %v204_v4 = vpack.c.bf16 %v189_v3, %v188_v2  ;;  %v191_v6 = vld [vmem:[%s2066_s25 + $0x18] sm:$0xff]  ;;  %v192_v7 = vld [vmem:[%s2066_s25 + $0x20] sm:$0xff]  ;;  %v193_v8 = vld [vmem:[%s2066_s25 + $0x28] sm:$0xff]  ;;  %1730 = vmatpush3.bf16.msra.mxu1 %v1877_v14  ;;  %1759 = vmatprep.subr.bf16.mxu0 %v1884_v34 }
  0x22   : > { %v205_v9 = vpack.c.bf16 %v191_v6, %v190_v5  ;;  %v206_v10 = vpack.c.bf16 %v193_v8, %v192_v7  ;;  %v194_v12 = vld [vmem:[%s2066_s25 + $0x30] sm:$0xff]  ;;  %v195_v13 = vld [vmem:[%s2066_s25 + $0x38] sm:$0xff]  ;;  %v196_v15 = vld [vmem:[%s2066_s25 + $0x40] sm:$0xff]  ;;  %1731 = vmatprep.subr.bf16.mxu1 %v1878_v17 }
  0x23   : > { %1711 = vmatprep.mubr.msk.bf16.mxu0 %vm233_vm0, %v204_v4  ;;  %v197_v16 = vld [vmem:[%s2066_s25 + $0x48] sm:$0xff]  ;;  %v207_v18 = vpack.c.bf16 %v195_v13, %v194_v12  ;;  %v198_v21 = vld [vmem:[%s2066_s25 + $0x50] sm:$0xff]  ;;  %v199_v22 = vld [vmem:[%s2066_s25 + $0x58] sm:$0xff] }
  0x24   : > { %1712 = vmatmul.mubr.msk.bf16.vlgmr.msra.gmra.mxu0 %vm233_vm0, %v205_v9  ;;  %v208_v20 = vpack.c.bf16 %v197_v16, %v196_v15  ;;  %v200_v23 = vld [vmem:[%s2066_s25 + $0x60] sm:$0xff]  ;;  %v201_v24 = vld [vmem:[%s2066_s25 + $0x68] sm:$0xff]  ;;  %v209_v26 = vpack.c.bf16 %v199_v22, %v198_v21  ;;  %v202_v28 = vld [vmem:[%s2066_s25 + $0x70] sm:$0xff] }
  0x25   : > { %1715 = vmatprep.mubr.msk.bf16.mxu0 %vm233_vm0, %v206_v10  ;;  %1732 = vmatpush3.bf16.msra.mxu1 %v1878_v17  ;;  %v210_v27 = vpack.c.bf16 %v201_v24, %v200_v23  ;;  %v203_v29 = vld [vmem:[%s2066_s25 + $0x78] sm:$0xff] }
  0x26   : > { %1733 = vmatprep.subr.bf16.mxu1 %v1879_v19  ;;  %v211_v30 = vpack.c.bf16 %v203_v29, %v202_v28  ;;  %1760 = vmatpush3.bf16.msra.mxu0 %v1884_v34  ;;  %v1891_v34 = vld [vmem:[%s2355_s1 + $0x80] sm:$0xff]  }
  0x27   : > { %1761 = vmatprep.subr.bf16.mxu0 %v1885_v35 }
  0x29   : > { %1734 = vmatpush3.bf16.msra.mxu1 %v1879_v19 }
  0x2a   : > { %1735 = vmatprep.subr.bf16.mxu1 %v1880_v25  ;;  %1762 = vmatpush3.bf16.msra.mxu0 %v1885_v35  ;;  %v1892_v35 = vld [vmem:[%s2355_s1 + $0xf8] sm:$0xff]  }
  0x2b   : > { %1763 = vmatprep.subr.bf16.mxu0 %v1886_v36 }
  0x2c   : > { %1716 = vmatmul.mubr.msk.bf16.gmra.mxu0 %vm233_vm0, %v207_v18 }
  0x2d   : > { %1719 = vmatprep.mubr.msk.bf16.mxu0 %vm233_vm0, %v208_v20  ;;  %1736 = vmatpush3.bf16.msra.mxu1 %v1880_v25 }
  0x2e   : > { %1737 = vmatprep.subr.bf16.mxu1 %v1881_v31  ;;  %1764 = vmatpush3.bf16.msra.mxu0 %v1886_v36  ;;  %v1893_v36 = vld [vmem:[%s2355_s1 + $0xf0] sm:$0xff]  }
  0x2f   : > { %1765 = vmatprep.subr.bf16.mxu0 %v1887_v37 }
  0x31   : > { %1738 = vmatpush3.bf16.msra.mxu1 %v1881_v31 }
  0x32   : > { %1739 = vmatprep.subr.bf16.mxu1 %v1882_v32  ;;  %1766 = vmatpush3.bf16.msra.mxu0 %v1887_v37  ;;  %v1894_v37 = vld [vmem:[%s2355_s1 + $0xe8] sm:$0xff]  }
  0x33   : > { %1767 = vmatprep.subr.bf16.mxu0 %v1888_v38 }
  0x34   : > { %1720 = vmatmul.mubr.msk.bf16.gmra.mxu0 %vm233_vm0, %v209_v26 }
  0x35   : > { %1723 = vmatprep.mubr.msk.bf16.mxu0 %vm233_vm0, %v210_v27  ;;  %1740 = vmatpush3.bf16.msra.mxu1 %v1882_v32  ;;  %v1889_v32 = vld [vmem:[%s2355_s1 + $0x90] sm:$0xff]  }
  0x36   : > { %1741 = vmatprep.subr.bf16.mxu1 %v1883_v33  ;;  %1768 = vmatpush3.bf16.msra.mxu0 %v1888_v38  ;;  %v1895_v38 = vld [vmem:[%s2355_s1 + $0xe0] sm:$0xff]  }
  0x37   : > { %1769 = vmatprep.subr.bf16.mxu0 %v1889_v32 }
  0x39   : > { %1742 = vmatpush3.bf16.msra.mxu1 %v1883_v33  ;;  %v1890_v33 = vld [vmem:[%s2355_s1 + $0x88] sm:$0xff]  }
  0x3a   : > { %1770 = vmatpush3.bf16.msra.mxu0 %v1889_v32  ;;  %1791 = vmatprep.subr.bf16.mxu1 %v1892_v35 }
  0x3b   : > { %1771 = vmatprep.subr.bf16.mxu0 %v1890_v33 }
  0x3c   : > { %1724 = vmatmul.mubr.msk.bf16.gmra.mxu0 %vm233_vm0, %v211_v30 }
  0x3e   : > { %1772 = vmatpush3.bf16.msra.mxu0 %v1890_v33  ;;  %v1897_v33 = vld [vmem:[%s2355_s1 + $0xd0] sm:$0xff]  }
  0x3f   : > { %1773 = vmatprep.subr.bf16.mxu0 %v1891_v34 }
  0x42   : > { %1774 = vmatpush3.bf16.msra.mxu0 %v1891_v34  ;;  %v1898_v34 = vld [vmem:[%s2355_s1 + $0xc8] sm:$0xff]  }
  0xe4   : > { %v1713_v39 = vpop.f32.mrf.mxu0 }
  0xe5   : > { %v301_v45 = vadd.f32 %v1713_v39, %v1441_v41  ;;  %v1896_v39 = vld [vmem:[%s2355_s1 + $0xd8] sm:$0xff]  }
  0xe6   : > { %v292_v40 = vpop.f32.mrf.mxu0 }
  0xe7   : > { %v293_v43 = vadd.f32 %v1441_v41, %v292_v40  ;;  %v357_v52 = vmax.f32 %v301_v45, 0.0 }
  0xe8   : > { %v1714_v42 = vpop.f32.mrf.mxu0 }
  0xe9   : > { %v304_v44 = vadd.f32 %v1714_v42, %v1441_v41  ;;  %v355_v50 = vmax.f32 %v293_v43, 0.0  ;;  %v1468_v42 = vld [vmem:[#allocation2 + $0x1] ss:$0 sm:$0xff] }
  0xea   : > { %v295_v46 = vpop.f32.mrf.mxu0 }
  0xeb   : > { %v296_v47 = vadd.f32 %v1441_v41, %v295_v46  ;;  %v358_v48 = vmax.f32 %v304_v44, 0.0 }
  0xec   : > { %v1717_v49 = vpop.f32.mrf.mxu0 }
  0xed   : > { %v356_v51 = vmax.f32 %v296_v47, 0.0  ;;  %v372_v55 = vpack.c.bf16 %v358_v48, %v357_v52  ;;  %v317_v59 = vadd.f32 %v1717_v49, %v1441_v41 }
  0xee   : > { %v308_v53 = vpop.f32.mrf.mxu0 }
  0xef   : > { %v371_v54 = vpack.c.bf16 %v356_v51, %v355_v50  ;;  %v309_v57 = vadd.f32 %v1441_v41, %v308_v53  ;;  %v361_v2 = vmax.f32 %v317_v59, 0.0 }
  0xf0   : > { %v1718_v56 = vpop.f32.mrf.mxu0 }
  0xf1   : > { %v320_v58 = vadd.f32 %v1718_v56, %v1441_v41  ;;  %1743 = vmatprep.mubr.bf16.mxu1 %v371_v54  ;;  %v359_v0 = vmax.f32 %v309_v57, 0.0 }
  0xf2   : > { %v311_v60 = vpop.f32.mrf.mxu0  ;;  %1744 = vmatmul.mubr.bf16.vlgmr.msra.gmra.mxu1 %v372_v55 }
  0xf3   : > { %v312_v61 = vadd.f32 %v1441_v41, %v311_v60  ;;  %v362_v62 = vmax.f32 %v320_v58, 0.0  ;;  %1792 = vmatpush3.bf16.msra.mxu1 %v1892_v35  ;;  %v1899_v35 = vld [vmem:[%s2355_s1 + $0xc0] sm:$0xff]  }
  0xf4   : > { %v1721_v63 = vpop.f32.mrf.mxu0  ;;  %1793 = vmatprep.subr.bf16.mxu1 %v1893_v36 }
  0xf5   : > { %v360_v1 = vmax.f32 %v312_v61, 0.0  ;;  %v374_v5 = vpack.c.bf16 %v362_v62, %v361_v2  ;;  %v333_v9 = vadd.f32 %v1721_v63, %v1441_v41 }
  0xf6   : > { %v324_v3 = vpop.f32.mrf.mxu0 }
  0xf7   : > { %v373_v4 = vpack.c.bf16 %v360_v1, %v359_v0  ;;  %v325_v7 = vadd.f32 %v1441_v41, %v324_v3  ;;  %v365_v16 = vmax.f32 %v333_v9, 0.0  ;;  %1794 = vmatpush3.bf16.msra.mxu1 %v1893_v36  ;;  %v1900_v36 = vld [vmem:[%s2355_s1 + $0x138] sm:$0xff]  }
  0xf8   : > { %v1722_v6 = vpop.f32.mrf.mxu0  ;;  %1795 = vmatprep.subr.bf16.mxu1 %v1894_v37  ;;  %1823 = vmatprep.subr.bf16.mxu0 %v1900_v36 }
  0xf9   : > { %v336_v8 = vadd.f32 %v1722_v6, %v1441_v41  ;;  %1747 = vmatprep.mubr.bf16.mxu1 %v373_v4  ;;  %v363_v14 = vmax.f32 %v325_v7, 0.0 }
  0xfa   : > { %v327_v10 = vpop.f32.mrf.mxu0  ;;  %1748 = vmatmul.mubr.bf16.gmra.mxu1 %v374_v5 }
  0xfb   : > { %v328_v11 = vadd.f32 %v1441_v41, %v327_v10  ;;  %v366_v12 = vmax.f32 %v336_v8, 0.0  ;;  %1796 = vmatpush3.bf16.msra.mxu1 %v1894_v37  ;;  %v1901_v37 = vld [vmem:[%s2355_s1 + $0x130] sm:$0xff]  }
  0xfc   : > { %v1725_v13 = vpop.f32.mrf.mxu0  ;;  %1797 = vmatprep.subr.bf16.mxu1 %v1895_v38 }
  0xfd   : > { %v364_v15 = vmax.f32 %v328_v11, 0.0  ;;  %v376_v19 = vpack.c.bf16 %v366_v12, %v365_v16  ;;  %v349_v23 = vadd.f32 %v1725_v13, %v1441_v41 }
  0xfe   : > { %v340_v17 = vpop.f32.mrf.mxu0 }
  0xff   : > { %v375_v18 = vpack.c.bf16 %v364_v15, %v363_v14  ;;  %v341_v21 = vadd.f32 %v1441_v41, %v340_v17  ;;  %v369_v29 = vmax.f32 %v349_v23, 0.0  ;;  %1798 = vmatpush3.bf16.msra.mxu1 %v1895_v38  ;;  %v1902_v38 = vld [vmem:[%s2355_s1 + $0x128] sm:$0xff]  }
 0x100   : > { %v1726_v20 = vpop.f32.mrf.mxu0  ;;  %1799 = vmatprep.subr.bf16.mxu1 %v1896_v39 }
 0x101   : > { %v352_v22 = vadd.f32 %v1726_v20, %v1441_v41  ;;  %1751 = vmatprep.mubr.bf16.mxu1 %v375_v18  ;;  %v367_v27 = vmax.f32 %v341_v21, 0.0 }
 0x102   : > { %v343_v24 = vpop.f32.mrf.mxu0  ;;  %1752 = vmatmul.mubr.bf16.gmra.mxu1 %v376_v19 }
 0x103   : > { %v344_v25 = vadd.f32 %v1441_v41, %v343_v24  ;;  %v370_v26 = vmax.f32 %v352_v22, 0.0  ;;  %1800 = vmatpush3.bf16.msra.mxu1 %v1896_v39  ;;  %v1903_v39 = vld [vmem:[%s2355_s1 + $0x120] sm:$0xff]  }
 0x104   : > { %1801 = vmatprep.subr.bf16.mxu1 %v1897_v33 }
 0x105   : > { %v368_v28 = vmax.f32 %v344_v25, 0.0  ;;  %v378_v31 = vpack.c.bf16 %v370_v26, %v369_v29 }
 0x107   : > { %v377_v30 = vpack.c.bf16 %v368_v28, %v367_v27  ;;  %1802 = vmatpush3.bf16.msra.mxu1 %v1897_v33 }
 0x108   : > { %1803 = vmatprep.subr.bf16.mxu1 %v1898_v34 }
 0x109   : > { %1755 = vmatprep.mubr.bf16.mxu1 %v377_v30 }
 0x10a   : > { %1756 = vmatmul.mubr.bf16.gmra.mxu1 %v378_v31 }
 0x10b   : > { %1804 = vmatpush3.bf16.msra.mxu1 %v1898_v34  ;;  %v1905_v34 = vld [vmem:[%s2355_s1 + $0x110] sm:$0xff]  }
 0x10c   : > { %1805 = vmatprep.subr.bf16.mxu1 %v1899_v35 }
 0x10f   : > { %1806 = vmatpush3.bf16.msra.mxu1 %v1899_v35  ;;  %v1906_v35 = vld [vmem:[%s2355_s1 + $0x108] sm:$0xff]  }
 0x1b2   : > { %v1745_v40 = vpop.f32.mrf.mxu1 }
 0x1b3   : > { %v492_v46 = vadd.f32 %v1745_v40, %v1468_v42  ;;  %v1904_v40 = vld [vmem:[%s2355_s1 + $0x118] sm:$0xff]  }
 0x1b4   : > { %v483_v41 = vpop.f32.mrf.mxu1 }
 0x1b5   : > { %v484_v44 = vadd.f32 %v1468_v42, %v483_v41  ;;  %v548_v53 = vmax.f32 %v492_v46, 0.0 }
 0x1b6   : > { %v1746_v43 = vpop.f32.mrf.mxu1 }
 0x1b7   : > { %v495_v45 = vadd.f32 %v1746_v43, %v1468_v42  ;;  %v546_v51 = vmax.f32 %v484_v44, 0.0  ;;  %v1493_v43 = vld [vmem:[#allocation2 + $0x2] ss:$0 sm:$0xff] }
 0x1b8   : > { %v486_v47 = vpop.f32.mrf.mxu1 }
 0x1b9   : > { %v487_v48 = vadd.f32 %v1468_v42, %v486_v47  ;;  %v549_v49 = vmax.f32 %v495_v45, 0.0 }
 0x1ba   : > { %v1749_v50 = vpop.f32.mrf.mxu1 }
 0x1bb   : > { %v547_v52 = vmax.f32 %v487_v48, 0.0  ;;  %v563_v56 = vpack.c.bf16 %v549_v49, %v548_v53  ;;  %v508_v60 = vadd.f32 %v1749_v50, %v1468_v42 }
 0x1bc   : > { %v499_v54 = vpop.f32.mrf.mxu1 }
 0x1bd   : > { %v562_v55 = vpack.c.bf16 %v547_v52, %v546_v51  ;;  %v500_v58 = vadd.f32 %v1468_v42, %v499_v54  ;;  %v552_v3 = vmax.f32 %v508_v60, 0.0 }
 0x1be   : > { %v1750_v57 = vpop.f32.mrf.mxu1 }
 0x1bf   : > { %v511_v59 = vadd.f32 %v1750_v57, %v1468_v42  ;;  %1775 = vmatprep.mubr.bf16.mxu0 %v562_v55  ;;  %v550_v1 = vmax.f32 %v500_v58, 0.0 }
 0x1c0   : > { %v502_v61 = vpop.f32.mrf.mxu1  ;;  %1776 = vmatmul.mubr.bf16.vlgmr.msra.gmra.mxu0 %v563_v56 }
 0x1c1   : > { %v503_v62 = vadd.f32 %v1468_v42, %v502_v61  ;;  %v553_v63 = vmax.f32 %v511_v59, 0.0  ;;  %1824 = vmatpush3.bf16.msra.mxu0 %v1900_v36  ;;  %v1907_v36 = vld [vmem:[%s2355_s1 + $0x100] sm:$0xff]  }
 0x1c2   : > { %v1753_v0 = vpop.f32.mrf.mxu1  ;;  %1825 = vmatprep.subr.bf16.mxu0 %v1901_v37 }
 0x1c3   : > { %v551_v2 = vmax.f32 %v503_v62, 0.0  ;;  %v565_v6 = vpack.c.bf16 %v553_v63, %v552_v3  ;;  %v524_v10 = vadd.f32 %v1753_v0, %v1468_v42 }
 0x1c4   : > { %v515_v4 = vpop.f32.mrf.mxu1 }
 0x1c5   : > { %v564_v5 = vpack.c.bf16 %v551_v2, %v550_v1  ;;  %v516_v8 = vadd.f32 %v1468_v42, %v515_v4  ;;  %v556_v17 = vmax.f32 %v524_v10, 0.0  ;;  %1826 = vmatpush3.bf16.msra.mxu0 %v1901_v37 }
 0x1c6   : > { %v1754_v7 = vpop.f32.mrf.mxu1  ;;  %1827 = vmatprep.subr.bf16.mxu0 %v1902_v38 }
 0x1c7   : > { %v527_v9 = vadd.f32 %v1754_v7, %v1468_v42  ;;  %1779 = vmatprep.mubr.bf16.mxu0 %v564_v5  ;;  %v554_v15 = vmax.f32 %v516_v8, 0.0 }
 0x1c8   : > { %v518_v11 = vpop.f32.mrf.mxu1  ;;  %1780 = vmatmul.mubr.bf16.gmra.mxu0 %v565_v6 }
 0x1c9   : > { %v519_v12 = vadd.f32 %v1468_v42, %v518_v11  ;;  %v557_v13 = vmax.f32 %v527_v9, 0.0  ;;  %1828 = vmatpush3.bf16.msra.mxu0 %v1902_v38 }
 0x1ca   : > { %v1757_v14 = vpop.f32.mrf.mxu1  ;;  %1829 = vmatprep.subr.bf16.mxu0 %v1903_v39 }
 0x1cb   : > { %v555_v16 = vmax.f32 %v519_v12, 0.0  ;;  %v567_v20 = vpack.c.bf16 %v557_v13, %v556_v17  ;;  %v540_v24 = vadd.f32 %v1757_v14, %v1468_v42 }
 0x1cc   : > { %v531_v18 = vpop.f32.mrf.mxu1 }
 0x1cd   : > { %v566_v19 = vpack.c.bf16 %v555_v16, %v554_v15  ;;  %v532_v22 = vadd.f32 %v1468_v42, %v531_v18  ;;  %v560_v30 = vmax.f32 %v540_v24, 0.0  ;;  %1830 = vmatpush3.bf16.msra.mxu0 %v1903_v39  ;;  %v1518_v39 = vld [vmem:[#allocation2 + $0x3] ss:$0 sm:$0xff] }
 0x1ce   : > { %v1758_v21 = vpop.f32.mrf.mxu1  ;;  %1831 = vmatprep.subr.bf16.mxu0 %v1904_v40 }
 0x1cf   : > { %v543_v23 = vadd.f32 %v1758_v21, %v1468_v42  ;;  %1783 = vmatprep.mubr.bf16.mxu0 %v566_v19  ;;  %v558_v28 = vmax.f32 %v532_v22, 0.0 }
 0x1d0   : > { %v534_v25 = vpop.f32.mrf.mxu1  ;;  %1784 = vmatmul.mubr.bf16.gmra.mxu0 %v567_v20 }
 0x1d1   : > { %v535_v26 = vadd.f32 %v1468_v42, %v534_v25  ;;  %v561_v27 = vmax.f32 %v543_v23, 0.0  ;;  %1832 = vmatpush3.bf16.msra.mxu0 %v1904_v40 }
 0x1d2   : > { %1833 = vmatprep.subr.bf16.mxu0 %v1905_v34 }
 0x1d3   : > { %v559_v29 = vmax.f32 %v535_v26, 0.0  ;;  %v569_v32 = vpack.c.bf16 %v561_v27, %v560_v30 }
 0x1d5   : > { %v568_v31 = vpack.c.bf16 %v559_v29, %v558_v28  ;;  %1834 = vmatpush3.bf16.msra.mxu0 %v1905_v34 }
 0x1d6   : > { %1835 = vmatprep.subr.bf16.mxu0 %v1906_v35 }
 0x1d7   : > { %1787 = vmatprep.mubr.bf16.mxu0 %v568_v31 }
 0x1d8   : > { %1788 = vmatmul.mubr.bf16.gmra.mxu0 %v569_v32 }
 0x1d9   : > { %1836 = vmatpush3.bf16.msra.mxu0 %v1906_v35 }
 0x1da   : > { %1837 = vmatprep.subr.bf16.mxu0 %v1907_v36 }
 0x1dd   : > { %1838 = vmatpush3.bf16.msra.mxu0 %v1907_v36 }
 0x280   : > { %v1777_v41 = vpop.f32.mrf.mxu0 }
 0x281   : > { %v683_v47 = vadd.f32 %v1777_v41, %v1493_v43 }
 0x282   : > { %v674_v42 = vpop.f32.mrf.mxu0 }
 0x283   : > { %v675_v45 = vadd.f32 %v1493_v43, %v674_v42  ;;  %v739_v54 = vmax.f32 %v683_v47, 0.0 }
 0x284   : > { %v1778_v44 = vpop.f32.mrf.mxu0 }
 0x285   : > { %v686_v46 = vadd.f32 %v1778_v44, %v1493_v43  ;;  %v737_v52 = vmax.f32 %v675_v45, 0.0 }
 0x286   : > { %v677_v48 = vpop.f32.mrf.mxu0 }
 0x287   : > { %v678_v49 = vadd.f32 %v1493_v43, %v677_v48  ;;  %v740_v50 = vmax.f32 %v686_v46, 0.0 }
 0x288   : > { %v1781_v51 = vpop.f32.mrf.mxu0 }
 0x289   : > { %v738_v53 = vmax.f32 %v678_v49, 0.0  ;;  %v754_v57 = vpack.c.bf16 %v740_v50, %v739_v54  ;;  %v699_v61 = vadd.f32 %v1781_v51, %v1493_v43 }
 0x28a   : > { %v690_v55 = vpop.f32.mrf.mxu0 }
 0x28b   : > { %v753_v56 = vpack.c.bf16 %v738_v53, %v737_v52  ;;  %v691_v59 = vadd.f32 %v1493_v43, %v690_v55  ;;  %v743_v4 = vmax.f32 %v699_v61, 0.0 }
 0x28c   : > { %v1782_v58 = vpop.f32.mrf.mxu0 }
 0x28d   : > { %v702_v60 = vadd.f32 %v1782_v58, %v1493_v43  ;;  %1807 = vmatprep.mubr.bf16.mxu1 %v753_v56  ;;  %v741_v2 = vmax.f32 %v691_v59, 0.0 }
 0x28e   : > { %v693_v62 = vpop.f32.mrf.mxu0  ;;  %1808 = vmatmul.mubr.bf16.vlgmr.msra.gmra.mxu1 %v754_v57 }
 0x28f   : > { %v694_v63 = vadd.f32 %v1493_v43, %v693_v62  ;;  %v744_v0 = vmax.f32 %v702_v60, 0.0 }
 0x290   : > { %v1785_v1 = vpop.f32.mrf.mxu0 }
 0x291   : > { %v742_v3 = vmax.f32 %v694_v63, 0.0  ;;  %v756_v7 = vpack.c.bf16 %v744_v0, %v743_v4  ;;  %v715_v11 = vadd.f32 %v1785_v1, %v1493_v43 }
 0x292   : > { %v706_v5 = vpop.f32.mrf.mxu0 }
 0x293   : > { %v755_v6 = vpack.c.bf16 %v742_v3, %v741_v2  ;;  %v707_v9 = vadd.f32 %v1493_v43, %v706_v5  ;;  %v747_v18 = vmax.f32 %v715_v11, 0.0 }
 0x294   : > { %v1786_v8 = vpop.f32.mrf.mxu0 }
 0x295   : > { %v718_v10 = vadd.f32 %v1786_v8, %v1493_v43  ;;  %1811 = vmatprep.mubr.bf16.mxu1 %v755_v6  ;;  %v745_v16 = vmax.f32 %v707_v9, 0.0 }
 0x296   : > { %v709_v12 = vpop.f32.mrf.mxu0  ;;  %1812 = vmatmul.mubr.bf16.gmra.mxu1 %v756_v7 }
 0x297   : > { %v710_v13 = vadd.f32 %v1493_v43, %v709_v12  ;;  %v748_v14 = vmax.f32 %v718_v10, 0.0 }
 0x298   : > { %v1789_v15 = vpop.f32.mrf.mxu0 }
 0x299   : > { %v746_v17 = vmax.f32 %v710_v13, 0.0  ;;  %v758_v21 = vpack.c.bf16 %v748_v14, %v747_v18  ;;  %v731_v25 = vadd.f32 %v1789_v15, %v1493_v43 }
 0x29a   : > { %v722_v19 = vpop.f32.mrf.mxu0 }
 0x29b   : > { %v757_v20 = vpack.c.bf16 %v746_v17, %v745_v16  ;;  %v723_v23 = vadd.f32 %v1493_v43, %v722_v19  ;;  %v751_v31 = vmax.f32 %v731_v25, 0.0 }
 0x29c   : > { %v1790_v22 = vpop.f32.mrf.mxu0 }
 0x29d   : > { %v734_v24 = vadd.f32 %v1790_v22, %v1493_v43  ;;  %1815 = vmatprep.mubr.bf16.mxu1 %v757_v20  ;;  %v749_v29 = vmax.f32 %v723_v23, 0.0 }
 0x29e   : > { %v725_v26 = vpop.f32.mrf.mxu0  ;;  %1816 = vmatmul.mubr.bf16.gmra.mxu1 %v758_v21 }
 0x29f   : > { %v726_v27 = vadd.f32 %v1493_v43, %v725_v26  ;;  %v752_v28 = vmax.f32 %v734_v24, 0.0 }
 0x2a1   : > { %v750_v30 = vmax.f32 %v726_v27, 0.0  ;;  %v760_v33 = vpack.c.bf16 %v752_v28, %v751_v31 }
 0x2a3   : > { %v759_v32 = vpack.c.bf16 %v750_v30, %v749_v29  ;;  %v1119_v30 = vlaneseq }
 0x2a5   : > { %1819 = vmatprep.mubr.bf16.mxu1 %v759_v32  ;;  %v2194_v31 = vand.u32 127, %v1119_v30  ;;  %v1543_v32 = vld [vmem:[#allocation2 + $0x4] ss:$0 sm:$0xff] }
 0x2a6   : > { %1820 = vmatmul.mubr.bf16.gmra.mxu1 %v760_v33 }
 0x2a7   : > { %vm1121_vm1 = vcmp.lt.s32.totalorder %v2194_v31, 16 }
 0x34e   : > { %v1809_v37 = vpop.f32.mrf.mxu1 }
 0x34f   : > { %v874_v43 = vadd.f32 %v1809_v37, %v1518_v39 }
 0x350   : > { %v865_v38 = vpop.f32.mrf.mxu1 }
 0x351   : > { %v866_v41 = vadd.f32 %v1518_v39, %v865_v38  ;;  %v930_v50 = vmax.f32 %v874_v43, 0.0 }
 0x352   : > { %v1810_v40 = vpop.f32.mrf.mxu1 }
 0x353   : > { %v877_v42 = vadd.f32 %v1810_v40, %v1518_v39  ;;  %v928_v48 = vmax.f32 %v866_v41, 0.0 }
 0x354   : > { %v868_v44 = vpop.f32.mrf.mxu1 }
 0x355   : > { %v869_v45 = vadd.f32 %v1518_v39, %v868_v44  ;;  %v931_v46 = vmax.f32 %v877_v42, 0.0 }
 0x356   : > { %v1813_v47 = vpop.f32.mrf.mxu1 }
 0x357   : > { %v929_v49 = vmax.f32 %v869_v45, 0.0  ;;  %v945_v53 = vpack.c.bf16 %v931_v46, %v930_v50  ;;  %v890_v57 = vadd.f32 %v1813_v47, %v1518_v39 }
 0x358   : > { %v881_v51 = vpop.f32.mrf.mxu1 }
 0x359   : > { %v944_v52 = vpack.c.bf16 %v929_v49, %v928_v48  ;;  %v882_v55 = vadd.f32 %v1518_v39, %v881_v51  ;;  %v934_v0 = vmax.f32 %v890_v57, 0.0 }
 0x35a   : > { %v1814_v54 = vpop.f32.mrf.mxu1 }
 0x35b   : > { %v893_v56 = vadd.f32 %v1814_v54, %v1518_v39  ;;  %1839 = vmatprep.mubr.bf16.mxu0 %v944_v52  ;;  %v932_v62 = vmax.f32 %v882_v55, 0.0 }
 0x35c   : > { %v884_v58 = vpop.f32.mrf.mxu1  ;;  %1840 = vmatmul.mubr.bf16.vlgmr.msra.gmra.mxu0 %v945_v53 }
 0x35d   : > { %v885_v59 = vadd.f32 %v1518_v39, %v884_v58  ;;  %v935_v60 = vmax.f32 %v893_v56, 0.0 }
 0x35e   : > { %v1817_v61 = vpop.f32.mrf.mxu1 }
 0x35f   : > { %v933_v63 = vmax.f32 %v885_v59, 0.0  ;;  %v947_v3 = vpack.c.bf16 %v935_v60, %v934_v0  ;;  %v906_v7 = vadd.f32 %v1817_v61, %v1518_v39 }
 0x360   : > { %v897_v1 = vpop.f32.mrf.mxu1 }
 0x361   : > { %v946_v2 = vpack.c.bf16 %v933_v63, %v932_v62  ;;  %v898_v5 = vadd.f32 %v1518_v39, %v897_v1  ;;  %v938_v14 = vmax.f32 %v906_v7, 0.0 }
 0x362   : > { %v1818_v4 = vpop.f32.mrf.mxu1 }
 0x363   : > { %v909_v6 = vadd.f32 %v1818_v4, %v1518_v39  ;;  %1843 = vmatprep.mubr.bf16.mxu0 %v946_v2  ;;  %v936_v12 = vmax.f32 %v898_v5, 0.0 }
 0x364   : > { %v900_v8 = vpop.f32.mrf.mxu1  ;;  %1844 = vmatmul.mubr.bf16.gmra.mxu0 %v947_v3 }
 0x365   : > { %v901_v9 = vadd.f32 %v1518_v39, %v900_v8  ;;  %v939_v10 = vmax.f32 %v909_v6, 0.0 }
 0x366   : > { %v1821_v11 = vpop.f32.mrf.mxu1 }
 0x367   : > { %v937_v13 = vmax.f32 %v901_v9, 0.0  ;;  %v949_v17 = vpack.c.bf16 %v939_v10, %v938_v14  ;;  %v922_v21 = vadd.f32 %v1821_v11, %v1518_v39 }
 0x368   : > { %v913_v15 = vpop.f32.mrf.mxu1 }
 0x369   : > { %v948_v16 = vpack.c.bf16 %v937_v13, %v936_v12  ;;  %v914_v19 = vadd.f32 %v1518_v39, %v913_v15  ;;  %v942_v27 = vmax.f32 %v922_v21, 0.0 }
 0x36a   : > { %v1822_v18 = vpop.f32.mrf.mxu1 }
 0x36b   : > { %v925_v20 = vadd.f32 %v1822_v18, %v1518_v39  ;;  %1847 = vmatprep.mubr.bf16.mxu0 %v948_v16  ;;  %v940_v25 = vmax.f32 %v914_v19, 0.0 }
 0x36c   : > { %v916_v22 = vpop.f32.mrf.mxu1  ;;  %1848 = vmatmul.mubr.bf16.gmra.mxu0 %v949_v17 }
 0x36d   : > { %v917_v23 = vadd.f32 %v1518_v39, %v916_v22  ;;  %v943_v24 = vmax.f32 %v925_v20, 0.0 }
 0x36f   : > { %v941_v26 = vmax.f32 %v917_v23, 0.0  ;;  %v951_v29 = vpack.c.bf16 %v943_v24, %v942_v27 }
 0x371   : > { %v950_v28 = vpack.c.bf16 %v941_v26, %v940_v25 }
 0x373   : > { %1851 = vmatprep.mubr.bf16.mxu0 %v950_v28 }
 0x374   : > { %1852 = vmatmul.mubr.bf16.gmra.mxu0 %v951_v29 }
 0x41c   : > { %v1841_v33 = vpop.f32.mrf.mxu0 }
 0x41d   : > { %v1065_v34 = vadd.f32 %v1841_v33, %v1543_v32 }
 0x41e   : > { %v1056_v35 = vpop.f32.mrf.mxu0 }
 0x41f   : > { %v1057_v36 = vadd.f32 %v1543_v32, %v1056_v35  ;;  %v2199_v37 = vsel %vm1121_vm1, %v1065_v34, -inf }
 0x420   : > { %1142 = vmax.xlane.f32.xlu1 %v2199_v37  ;;  %v1842_v38 = vpop.f32.mrf.mxu0 }
 0x421   : > { %v1068_v39 = vadd.f32 %v1842_v38, %v1543_v32  ;;  %v2204_v40 = vsel %vm1121_vm1, %v1057_v36, -inf }
 0x422   : > { %v1059_v41 = vpop.f32.mrf.mxu0  ;;  %1138 = vmax.xlane.f32.xlu0 %v2204_v40 }
 0x423   : > { %v1060_v42 = vadd.f32 %v1543_v32, %v1059_v41  ;;  %v1125_v43 = vsel %vm1121_vm1, %v1068_v39, -inf }
 0x424   : > { %1144 = vmax.xlane.f32.xlu1 %v1125_v43  ;;  %v1845_v44 = vpop.f32.mrf.mxu0 }
 0x425   : > { %v1081_v45 = vadd.f32 %v1845_v44, %v1543_v32  ;;  %v1123_v46 = vsel %vm1121_vm1, %v1060_v42, -inf }
 0x426   : > { %v1072_v47 = vpop.f32.mrf.mxu0  ;;  %1140 = vmax.xlane.f32.xlu0 %v1123_v46 }
 0x427   : > { %v1073_v49 = vadd.f32 %v1543_v32, %v1072_v47  ;;  %v1128_v51 = vsel %vm1121_vm1, %v1081_v45, -inf }
 0x428   : > { %v1846_v48 = vpop.f32.mrf.mxu0 }
 0x429   : > { %v1084_v50 = vadd.f32 %v1846_v48, %v1543_v32  ;;  %v1126_v57 = vsel %vm1121_vm1, %v1073_v49, -inf }
 0x42a   : > { %v1075_v52 = vpop.f32.mrf.mxu0  ;;  %1150 = vmax.xlane.f32.xlu0 %v1128_v51 }
 0x42b   : > { %v1076_v53 = vadd.f32 %v1543_v32, %v1075_v52  ;;  %v1129_v54 = vsel %vm1121_vm1, %v1084_v50, -inf }
 0x42c   : > { %1152 = vmax.xlane.f32.xlu1 %v1129_v54  ;;  %v1849_v55 = vpop.f32.mrf.mxu0 }
 0x42d   : > { %v1097_v56 = vadd.f32 %v1849_v55, %v1543_v32  ;;  %v2219_v59 = vsel %vm1121_vm1, %v1076_v53, -inf }
 0x42e   : > { %v1088_v58 = vpop.f32.mrf.mxu0  ;;  %1146 = vmax.xlane.f32.xlu0 %v1126_v57 }
 0x42f   : > { %v1089_v61 = vadd.f32 %v1543_v32, %v1088_v58  ;;  %v2224_v63 = vsel %vm1121_vm1, %v1097_v56, -inf }
 0x430   : > { %v1850_v60 = vpop.f32.mrf.mxu0  ;;  %1148 = vmax.xlane.f32.xlu1 %v2219_v59 }
 0x431   : > { %v1100_v62 = vadd.f32 %v1850_v60, %v1543_v32  ;;  %v2234_v4 = vsel %vm1121_vm1, %v1089_v61, -inf }
 0x432   : > { %v1091_v0 = vpop.f32.mrf.mxu0  ;;  %1158 = vmax.xlane.f32.xlu0 %v2224_v63 }
 0x433   : > { %v1092_v1 = vadd.f32 %v1543_v32, %v1091_v0  ;;  %v2229_v2 = vsel %vm1121_vm1, %v1100_v62, -inf }
 0x434   : > { %v1853_v3 = vpop.f32.mrf.mxu0  ;;  %1160 = vmax.xlane.f32.xlu1 %v2229_v2 }
 0x435   : > { %v2239_v7 = vsel %vm1121_vm1, %v1092_v1, -inf  ;;  %v1113_v9 = vadd.f32 %v1853_v3, %v1543_v32 }
 0x436   : > { %v1104_v5 = vpop.f32.mrf.mxu0  ;;  %1154 = vmax.xlane.f32.xlu0 %v2234_v4 }
 0x437   : > { %v1105_v6 = vadd.f32 %v1543_v32, %v1104_v5  ;;  %v2253_v15 = vsel %vm1121_vm1, %v1113_v9, -inf }
 0x438   : > { %v1854_v8 = vpop.f32.mrf.mxu0  ;;  %1156 = vmax.xlane.f32.xlu1 %v2239_v7 }
 0x439   : > { %v2244_v10 = vsel %vm1121_vm1, %v1105_v6, -inf  ;;  %v1116_v13 = vadd.f32 %v1854_v8, %v1543_v32 }
 0x43a   : > { %v1107_v11 = vpop.f32.mrf.mxu0  ;;  %1162 = vmax.xlane.f32.xlu0 %v2244_v10 }
 0x43b   : > { %v1108_v12 = vadd.f32 %v1543_v32, %v1107_v11  ;;  %v2259_v16 = vsel %vm1121_vm1, %v1116_v13, -inf }
 0x43d   : > { %v2249_v14 = vsel %vm1121_vm1, %v1108_v12, -inf }
 0x43e   : > { %1164 = vmax.xlane.f32.xlu1 %v2249_v14  ;;  %1166 = vmax.xlane.f32.xlu0 %v2253_v15 }
 0x442   : > { %1168 = vmax.xlane.f32.xlu1 %v2259_v16 }
 0x4a9   : > { %v1143_v17 = vpop.xlane.xlu1 %1142 }
 0x4aa   : > { %v1172_v18 = vsub.f32 %v2199_v37, %v1143_v17 }
 0x4ab   : > { %v1139_v19 = vpop.xlane.xlu0 %1138 }
 0x4ac   : > { %v1190_v20 = vmul.f32 1.442695, %v1172_v18  ;;  %v1170_v21 = vsub.f32 %v2204_v40, %v1139_v19 }
 0x4ad   : > { %v1145_v22 = vpop.xlane.xlu1 %1144 }
 0x4ae   : > { %1908 = vpow2.f32 %v1190_v20  ;;  %v1186_v23 = vmul.f32 1.442695, %v1170_v21  ;;  %v1173_v24 = vsub.f32 %v1125_v43, %v1145_v22 }
 0x4af   : > { %v1141_v25 = vpop.xlane.xlu0 %1140 }
 0x4b0   : > { %v1192_v26 = vmul.f32 1.442695, %v1173_v24  ;;  %v1171_v27 = vsub.f32 %v1123_v46, %v1141_v25  ;;  %1910 = vpow2.f32 %v1186_v23 }
 0x4b2   : > { %1912 = vpow2.f32 %v1192_v26  ;;  %v1188_v28 = vmul.f32 1.442695, %v1171_v27 }
 0x4b3   : > { %v1151_v29 = vpop.xlane.xlu0 %1150 }
 0x4b4   : > { %v1176_v30 = vsub.f32 %v1128_v51, %v1151_v29  ;;  %1914 = vpow2.f32 %v1188_v28 }
 0x4b5   : > { %v1153_v31 = vpop.xlane.xlu1 %1152 }
 0x4b6   : > { %v1198_v32 = vmul.f32 1.442695, %v1176_v30  ;;  %v1177_v33 = vsub.f32 %v1129_v54, %v1153_v31 }
 0x4b7   : > { %v1147_v34 = vpop.xlane.xlu0 %1146 }
 0x4b8   : > { %1916 = vpow2.f32 %v1198_v32  ;;  %v1200_v35 = vmul.f32 1.442695, %v1177_v33  ;;  %v1174_v36 = vsub.f32 %v1126_v57, %v1147_v34 }
 0x4b9   : > { %v1149_v37 = vpop.xlane.xlu1 %1148 }
 0x4ba   : > { %1918 = vpow2.f32 %v1200_v35  ;;  %v1194_v38 = vmul.f32 1.442695, %v1174_v36  ;;  %v1175_v39 = vsub.f32 %v2219_v59, %v1149_v37 }
 0x4bb   : > { %v2265_v40 = vpop.eup %1908  ;;  %v1159_v41 = vpop.xlane.xlu0 %1158 }
 0x4bc   : > { %1920 = vpow2.f32 %v1194_v38  ;;  %v1196_v42 = vmul.f32 1.442695, %v1175_v39  ;;  %v1180_v43 = vsub.f32 %v2224_v63, %v1159_v41  ;;  %1222 = vadd.xlane.f32.xlu0 %v2265_v40 }
 0x4bd   : > { %v1161_v44 = vpop.xlane.xlu1 %1160  ;;  %v2269_v45 = vpop.eup %1910 }
 0x4be   : > { %1922 = vpow2.f32 %v1196_v42  ;;  %v1206_v46 = vmul.f32 1.442695, %v1180_v43  ;;  %v1181_v47 = vsub.f32 %v2229_v2, %v1161_v44 }
 0x4bf   : > { %v2272_v48 = vpop.eup %1912  ;;  %v1155_v49 = vpop.xlane.xlu0 %1154 }
 0x4c0   : > { %1924 = vpow2.f32 %v1206_v46  ;;  %v1208_v50 = vmul.f32 1.442695, %v1181_v47  ;;  %v1178_v51 = vsub.f32 %v2234_v4, %v1155_v49  ;;  %1224 = vadd.xlane.f32.xlu1 %v2272_v48  ;;  %1218 = vadd.xlane.f32.xlu0 %v2269_v45 }
 0x4c1   : > { %v1157_v52 = vpop.xlane.xlu1 %1156  ;;  %v2278_v55 = vpop.eup %1914 }
 0x4c2   : > { %1926 = vpow2.f32 %v1208_v50  ;;  %v1202_v53 = vmul.f32 1.442695, %v1178_v51  ;;  %v1179_v54 = vsub.f32 %v2239_v7, %v1157_v52 }
 0x4c3   : > { %v1163_v56 = vpop.xlane.xlu0 %1162 }
 0x4c4   : > { %1928 = vpow2.f32 %v1202_v53  ;;  %v1204_v57 = vmul.f32 1.442695, %v1179_v54  ;;  %v1182_v58 = vsub.f32 %v2244_v10, %v1163_v56  ;;  %1220 = vadd.xlane.f32.xlu1 %v2278_v55 }
 0x4c5   : > { %v2282_v59 = vpop.eup %1916 }
 0x4c6   : > { %1930 = vpow2.f32 %v1204_v57  ;;  %v1210_v60 = vmul.f32 1.442695, %v1182_v58  ;;  %1230 = vadd.xlane.f32.xlu0 %v2282_v59 }
 0x4c7   : > { %v2285_v61 = vpop.eup %1918  ;;  %v1165_v62 = vpop.xlane.xlu1 %1164 }
 0x4c8   : > { %v1167_v63 = vpop.xlane.xlu0 %1166  ;;  %1932 = vpow2.f32 %v1210_v60  ;;  %v1183_v0 = vsub.f32 %v2249_v14, %v1165_v62  ;;  %1232 = vadd.xlane.f32.xlu1 %v2285_v61 }
 0x4c9   : > { %v1184_v1 = vsub.f32 %v2253_v15, %v1167_v63  ;;  %v2290_v2 = vpop.eup %1920 }
 0x4ca   : > { %v1212_v3 = vmul.f32 1.442695, %v1183_v0  ;;  %1226 = vadd.xlane.f32.xlu0 %v2290_v2 }
 0x4cb   : > { %v1214_v4 = vmul.f32 1.442695, %v1184_v1  ;;  %v2293_v5 = vpop.eup %1922  ;;  %v1169_v6 = vpop.xlane.xlu1 %1168 }
 0x4cc   : > { %1934 = vpow2.f32 %v1212_v3  ;;  %v1185_v7 = vsub.f32 %v2259_v16, %v1169_v6  ;;  %1228 = vadd.xlane.f32.xlu1 %v2293_v5 }
 0x4cd   : > { %v2297_v8 = vpop.eup %1924  ;;  %1936 = vpow2.f32 %v1214_v4 }
 0x4ce   : > { %v1216_v9 = vmul.f32 1.442695, %v1185_v7  ;;  %1238 = vadd.xlane.f32.xlu0 %v2297_v8 }
 0x4cf   : > { %v2300_v10 = vpop.eup %1926 }
 0x4d0   : > { %1938 = vpow2.f32 %v1216_v9  ;;  %1240 = vadd.xlane.f32.xlu1 %v2300_v10 }
 0x4d1   : > { %v2303_v11 = vpop.eup %1928 }
 0x4d2   : > { %1234 = vadd.xlane.f32.xlu0 %v2303_v11 }
 0x4d3   : > { %v2306_v12 = vpop.eup %1930 }
 0x4d4   : > { %1236 = vadd.xlane.f32.xlu1 %v2306_v12 }
 0x4d5   : > { %v2309_v13 = vpop.eup %1932 }
 0x4d6   : > { %1242 = vadd.xlane.f32.xlu0 %v2309_v13 }
 0x4d9   : > { %v2312_v14 = vpop.eup %1934 }
 0x4da   : > { %v2314_v15 = vpop.eup %1936  ;;  %1244 = vadd.xlane.f32.xlu1 %v2312_v14 }
 0x4db   : > { %1246 = vadd.xlane.f32.xlu0 %v2314_v15 }
 0x4dd   : > { %v2318_v16 = vpop.eup %1938 }
 0x4de   : > { %1248 = vadd.xlane.f32.xlu1 %v2318_v16 }
 0x545   : > { %v1223_v17 = vpop.xlane.xlu0 %1222 }
 0x546   : > { %1940 = vrcp.f32 %v1223_v17 }
 0x549   : > { %v1225_v18 = vpop.xlane.xlu1 %1224  ;;  %v1219_v19 = vpop.xlane.xlu0 %1218 }
 0x54a   : > { %1942 = vrcp.f32 %v1225_v18 }
 0x54b   : > { %1944 = vrcp.f32 %v1219_v19 }
 0x54d   : > { %v1221_v20 = vpop.xlane.xlu1 %1220 }
 0x54e   : > { %1946 = vrcp.f32 %v1221_v20 }
 0x54f   : > { %v1231_v21 = vpop.xlane.xlu0 %1230 }
 0x550   : > { %1948 = vrcp.f32 %v1231_v21 }
 0x551   : > { %v1233_v22 = vpop.xlane.xlu1 %1232 }
 0x552   : > { %1950 = vrcp.f32 %v1233_v22 }
 0x553   : > { %v1227_v23 = vpop.xlane.xlu0 %1226  ;;  %v1941_v24 = vpop.eup %1940 }
 0x554   : > { %1952 = vrcp.f32 %v1227_v23  ;;  %v1255_v28 = vmul.f32 %v1941_v24, %v2265_v40 }
 0x555   : > { %v1229_v25 = vpop.xlane.xlu1 %1228 }
 0x556   : > { %1954 = vrcp.f32 %v1229_v25 }
 0x557   : > { %v1943_v26 = vpop.eup %1942  ;;  %v1239_v27 = vpop.xlane.xlu0 %1238 }
 0x558   : > { %v1257_v29 = vmul.f32 %v1943_v26, %v2272_v48  ;;  %1956 = vrcp.f32 %v1239_v27  ;;  %v1945_v30 = vpop.eup %1944 }
 0x559   : > { %v1241_v31 = vpop.xlane.xlu1 %1240  ;;  %v1251_v35 = vmul.f32 %v1945_v30, %v2269_v45 }
 0x55a   : > { %v1594_v32 = vpack.c.bf16 %v1257_v29, %v1255_v28  ;;  %1958 = vrcp.f32 %v1241_v31 }
 0x55b   : > { %v1947_v33 = vpop.eup %1946  ;;  %v1235_v34 = vpop.xlane.xlu0 %1234 }
 0x55c   : > { %1626 = vst [vmem:[%s2327_s22 + $0x8] sm:$0xff] %v1594_v32   ;;  %v1253_v36 = vmul.f32 %v1947_v33, %v2278_v55  ;;  %1960 = vrcp.f32 %v1235_v34 }
 0x55d   : > { %v1949_v37 = vpop.eup %1948  ;;  %v1237_v38 = vpop.xlane.xlu1 %1236 }
 0x55e   : > { %v1589_v39 = vpack.c.bf16 %v1253_v36, %v1251_v35  ;;  %1962 = vrcp.f32 %v1237_v38  ;;  %v1263_v42 = vmul.f32 %v1949_v37, %v2282_v59 }
 0x55f   : > { %v1951_v40 = vpop.eup %1950  ;;  %v1243_v41 = vpop.xlane.xlu0 %1242 }
 0x560   : > { %1590 = vst [vmem:[%s2327_s22] sm:$0xff] %v1589_v39   ;;  %v1265_v43 = vmul.f32 %v1951_v40, %v2285_v61  ;;  %1964 = vrcp.f32 %v1243_v41 }
 0x561   : > { %v1953_v44 = vpop.eup %1952 }
 0x562   : > { %v1604_v46 = vpack.c.bf16 %v1265_v43, %v1263_v42  ;;  %v1259_v48 = vmul.f32 %v1953_v44, %v2290_v2 }
 0x563   : > { %v1955_v45 = vpop.eup %1954  ;;  %v1245_v47 = vpop.xlane.xlu1 %1244 }
 0x564   : > { %1628 = vst [vmem:[%s2327_s22 + $0x18] sm:$0xff] %v1604_v46   ;;  %v1261_v49 = vmul.f32 %v1955_v45, %v2293_v5  ;;  %1966 = vrcp.f32 %v1245_v47  ;;  %v1247_v50 = vpop.xlane.xlu0 %1246 }
 0x565   : > { %v1957_v51 = vpop.eup %1956  ;;  %1968 = vrcp.f32 %v1247_v50 }
 0x566   : > { %v1599_v52 = vpack.c.bf16 %v1261_v49, %v1259_v48  ;;  %v1271_v55 = vmul.f32 %v1957_v51, %v2297_v8 }
 0x567   : > { %v1959_v53 = vpop.eup %1958  ;;  %v1249_v54 = vpop.xlane.xlu1 %1248 }
 0x568   : > { %1627 = vst [vmem:[%s2327_s22 + $0x10] sm:$0xff] %v1599_v52   ;;  %v1273_v56 = vmul.f32 %v1959_v53, %v2300_v10  ;;  %1970 = vrcp.f32 %v1249_v54 }
 0x569   : > { %v1961_v57 = vpop.eup %1960 }
 0x56a   : > { %v1614_v58 = vpack.c.bf16 %v1273_v56, %v1271_v55  ;;  %v1267_v60 = vmul.f32 %v1961_v57, %v2303_v11 }
 0x56b   : > { %v1963_v59 = vpop.eup %1962 }
 0x56c   : > { %1630 = vst [vmem:[%s2327_s22 + $0x28] sm:$0xff] %v1614_v58   ;;  %v1269_v61 = vmul.f32 %v1963_v59, %v2306_v12 }
 0x56d   : > { %v1965_v63 = vpop.eup %1964 }
 0x56e   : > { %v1609_v62 = vpack.c.bf16 %v1269_v61, %v1267_v60  ;;  %v1275_v1 = vmul.f32 %v1965_v63, %v2309_v13 }
 0x570   : > { %1629 = vst [vmem:[%s2327_s22 + $0x20] sm:$0xff] %v1609_v62  }
 0x571   : > { %v1967_v0 = vpop.eup %1966 }
 0x572   : > { %v1277_v2 = vmul.f32 %v1967_v0, %v2312_v14  ;;  %v1969_v3 = vpop.eup %1968 }
 0x573   : > { %v1279_v6 = vmul.f32 %v1969_v3, %v2314_v15 }
 0x574   : > { %v1619_v4 = vpack.c.bf16 %v1277_v2, %v1275_v1 }
 0x575   : > { %v1971_v5 = vpop.eup %1970 }
 0x576   : > { %1631 = vst [vmem:[%s2327_s22 + $0x30] sm:$0xff] %v1619_v4   ;;  %v1281_v7 = vmul.f32 %v1971_v5, %v2318_v16 }
 0x578   : > { %v1624_v8 = vpack.c.bf16 %v1281_v7, %v1279_v6 }
 0x57a   : > { %1632 = vst [vmem:[%s2327_s22 + $0x38] sm:$0xff] %v1624_v8  }
 0x57b PF: > { %s14_s12 = sadd.s32 1, %s2008_s12  }
 0x57c   : > { %p11_p1 = scmp.ge.s32.totalorder %s14_s12, 4  }
 0x57e   :  { %13 = sbr.rel (!%p11_p1) target bundleno = 1 (0x1), region = 71 }
 0x583   :  { %1384 = vsyncpa [#allocation3], 1 }
 0x584   :  { %1386 = vsyncpa [#allocation3 + $0x1], 1 }

</bundles_post_ra>
